<compile_context>
chip_gen: v7x
topology: tpu7x:2x2x1
jax: 0.10.0
libtpu: 0.0.40
codegen_flags: <defaults>
</compile_context>

<pallas_src>
import functools
import math

import jax
import jax.numpy as jnp
from jax.experimental import pallas as pl
from jax.experimental.pallas import tpu as pltpu


# ---------------------------------------------------------------------------
# Kernel body
# ---------------------------------------------------------------------------
def _ffn_kernel(x_ref, w12_ref, w3_ref, o_ref, acc_ref):
    # x_ref:   (tm, dim)      bf16 token tile
    # w12_ref: (dim, 2*tn)    bf16 fused [w1_tile | w2_tile]
    # w3_ref:  (tn, dim)      bf16 down-projection tile
    # o_ref:   (tm, dim)      output tile (written on last hidden step)
    # acc_ref: (tm, dim) f32  accumulator scratch (resident across hidden axis)
    j = pl.program_id(1)

    @pl.when(j == 0)
    def _init():
        acc_ref[...] = jnp.zeros_like(acc_ref)

    tn = w3_ref.shape[0]
    x = x_ref[...]
    # Fused gate/up projection: one MXU matmul, f32 accumulation.
    h12 = jnp.dot(x, w12_ref[...], preferred_element_type=jnp.float32)
    x1 = h12[:, :tn]
    x2 = h12[:, tn:]
    # SwiGLU gate in f32 (safe on v5e too: sigmoid on EUP, multiplies on VPU).
    gated = (x1 * jax.nn.sigmoid(x1)) * x2
    acc_ref[...] += jnp.dot(
        gated.astype(w3_ref.dtype), w3_ref[...], preferred_element_type=jnp.float32
    )

    @pl.when(j == pl.num_programs(1) - 1)
    def _store():
        o_ref[...] = acc_ref[...].astype(o_ref.dtype)


# ---------------------------------------------------------------------------
# Chip-aware defaults / tiling helpers
# ---------------------------------------------------------------------------
def _device_kind():
    try:
        return jax.devices()[0].device_kind.lower()
    except Exception:
        return ""


def _chip_defaults():
    """(tm, tn, vmem_cap) per TPU generation."""
    kind = _device_kind()
    if "v7" in kind:
        # 64 MiB VMEM/TC, 2 TCs share HBM -> trade tn down to fund a larger tm,
        # keep ~8 MiB headroom for compiler internal scratch.
        return dict(tm=768, tn=256, vmem_cap=56 * 1024 * 1024)
    if "v6" in kind:
        # 128 MiB physical VMEM; needs ~tm>=650 to be MXU-bound on the weight stream.
        return dict(tm=1024, tn=512, vmem_cap=100 * 1024 * 1024)
    if "v5" in kind:
        # 128 MiB physical VMEM; 4x128^2 MXU -> tm multiple of 128, 512 is plenty.
        return dict(tm=512, tn=512, vmem_cap=100 * 1024 * 1024)
    # Unknown / interpreter fallback.
    return dict(tm=512, tn=512, vmem_cap=64 * 1024 * 1024)


def _pick_hidden_tile(hidden, want, align=128):
    """Largest tile <= want that is a multiple of `align` and divides `hidden`
    (falls back to the full hidden dim for tiny shapes)."""
    if hidden <= want:
        return hidden
    t = (want // align) * align
    while t >= align:
        if hidden % t == 0:
            return t
        t -= align
    return hidden


def _vmem_estimate(tm, tn, dim, isz, osz):
    """VMEM bytes: double-buffered tiles + f32 accumulator + in-kernel temporaries."""
    return (
        2 * tm * dim * isz            # x tiles
        + 2 * dim * (2 * tn) * isz    # fused w1|w2 tiles
        + 2 * tn * dim * isz          # w3 tiles
        + 2 * tm * dim * osz          # output tiles
        + tm * dim * 4                # f32 accumulator scratch
        + tm * (2 * tn) * 4           # h12 f32 temporary
        + tm * tn * 4                 # gated f32 temporary
        + tm * tn * isz               # gated bf16 cast fed to the down projection
    )


# ---------------------------------------------------------------------------
# Weight packing (hoisted out of the hot path: do ONCE at weight-load time)
# ---------------------------------------------------------------------------
def pack_ffn_weights(w1, w2, w3, tn, compute_dtype=jnp.bfloat16):
    """w1, w2: [dim, hidden]; w3: [hidden, dim].
    Returns (w12, w3c): w12 is [dim, 2*hidden] where hidden-tile j of w12 is
    [w1[:, j*tn:(j+1)*tn] | w2[:, j*tn:(j+1)*tn]], both cast to compute_dtype."""
    dim, hidden = w1.shape
    assert hidden % tn == 0
    n_h = hidden // tn
    w12 = (
        jnp.concatenate(
            [w1.reshape(dim, n_h, tn), w2.reshape(dim, n_h, tn)], axis=-1
        )
        .reshape(dim, 2 * hidden)
        .astype(compute_dtype)
    )
    return w12, w3.astype(compute_dtype)


# ---------------------------------------------------------------------------
# Per-call entry point (pre-packed weights; jit-friendly)
# ---------------------------------------------------------------------------
def feed_forward_packed(x, w12, w3c, *, tn, tm=None, compute_dtype=jnp.bfloat16):
    """x: [..., dim]; w12: [dim, 2*hidden] (packed with tile width tn); w3c: [hidden, dim]."""
    orig_shape = x.shape
    dim = orig_shape[-1]
    m = math.prod(orig_shape[:-1])
    hidden = w3c.shape[0]
    assert w12.shape == (dim, 2 * hidden)
    assert hidden % tn == 0
    out_dtype = x.dtype

    defaults = _chip_defaults()
    vmem_cap = defaults["vmem_cap"]
    if tm is None:
        tm = defaults["tm"]
    tm = min(tm, m)
    if tm < m:
        tm = max(8, (tm // 8) * 8)  # tile rows must be a multiple of 8

    isz = jnp.dtype(compute_dtype).itemsize
    osz = jnp.dtype(out_dtype).itemsize

    # Shrink tm until the (honest) VMEM budget fits the chip cap.
    while tm > 128 and _vmem_estimate(tm, tn, dim, isz, osz) > vmem_cap:
        tm = max(128, tm // 2)
    vmem_est = _vmem_estimate(tm, tn, dim, isz, osz)
    vmem_limit = int(min(max(int(1.2 * vmem_est), 16 * 1024 * 1024), vmem_cap))

    n_h = hidden // tn
    n_m = pl.cdiv(m, tm)
    grid = (n_m, n_h)

    x2d = x.reshape(m, dim).astype(compute_dtype)

    cost = pl.CostEstimate(
        flops=6 * m * dim * hidden,         # gate + up + down projections
        transcendentals=m * hidden,         # sigmoid
        bytes_accessed=int(
            x2d.size * isz                  # activations in
            + m * dim * osz                 # activations out
            + n_m * (w12.size + w3c.size) * isz  # weights streamed once per token tile
        ),
    )

    out2d = pl.pallas_call(
        _ffn_kernel,
        out_shape=jax.ShapeDtypeStruct((m, dim), out_dtype),
        grid_spec=pltpu.PrefetchScalarGridSpec(
            num_scalar_prefetch=0,
            grid=grid,
            in_specs=[
                pl.BlockSpec((tm, dim), lambda i, j: (i, 0)),
                pl.BlockSpec((dim, 2 * tn), lambda i, j: (0, j)),
                pl.BlockSpec((tn, dim), lambda i, j: (j, 0)),
            ],
            out_specs=pl.BlockSpec((tm, dim), lambda i, j: (i, 0)),
            scratch_shapes=[pltpu.VMEM((tm, dim), jnp.float32)],
        ),
        compiler_params=pltpu.CompilerParams(
            dimension_semantics=("parallel", "arbitrary"),
            vmem_limit_bytes=vmem_limit,
        ),
        cost_estimate=cost,
    )(x2d, w12, w3c)
    return out2d.reshape(orig_shape)


# ---------------------------------------------------------------------------
# Convenience wrapper (packs per call; use the packed path in production)
# ---------------------------------------------------------------------------
def feed_forward(x, w1, w2, w3, *, tm=None, tn=None, compute_dtype=jnp.bfloat16):
    """x: [batch, seq, dim]; w1, w2: [dim, hidden]; w3: [hidden, dim]."""
    dim, hidden = w1.shape
    assert w2.shape == (dim, hidden) and w3.shape == (hidden, dim)
    defaults = _chip_defaults()
    tn = _pick_hidden_tile(hidden, tn if tn is not None else defaults["tn"])
    w12, w3c = pack_ffn_weights(w1, w2, w3, tn, compute_dtype)
    return feed_forward_packed(x, w12, w3c, tn=tn, tm=tm, compute_dtype=compute_dtype)


if __name__ == "__main__":
    # Small shapes consistent with the module (hidden = 4 * dim).
    batch, seq, dim = 2, 8, 32
    hidden_dim = 4 * dim  # 128

    key = jax.random.PRNGKey(0)
    kx, k1, k2, k3 = jax.random.split(key, 4)

    x = jax.random.normal(kx, (batch, seq, dim), dtype=jnp.float32)
    # nn.Linear stores weight as [out, in]; we keep [in, out] (pre-transposed).
    w1 = jax.random.normal(k1, (dim, hidden_dim), dtype=jnp.float32) * 0.02
    w2 = jax.random.normal(k2, (dim, hidden_dim), dtype=jnp.float32) * 0.02
    w3 = jax.random.normal(k3, (hidden_dim, dim), dtype=jnp.float32) * 0.02

    # Hot-path usage: pack weights ONCE, then call the jitted packed forward.
    tn = _pick_hidden_tile(hidden_dim, _chip_defaults()["tn"])
    w12, w3c = pack_ffn_weights(w1, w2, w3, tn)
    ffn = jax.jit(functools.partial(feed_forward_packed, tn=tn))
    out = ffn(x, w12, w3c)
    out = jax.block_until_ready(out)
    assert out.shape == (batch, seq, dim)

    # Convenience wrapper gives identical results.
    out2 = jax.block_until_ready(feed_forward(x, w1, w2, w3))
    assert jnp.allclose(out, out2, atol=1e-6, rtol=1e-6)

    # Reference replicating the kernel's bf16-operand / f32-accumulate math.
    xb = x.reshape(-1, dim).astype(jnp.bfloat16)
    w1b, w2b, w3b = (w.astype(jnp.bfloat16) for w in (w1, w2, w3))
    x1 = jnp.dot(xb, w1b, preferred_element_type=jnp.float32)
    x2 = jnp.dot(xb, w2b, preferred_element_type=jnp.float32)
    h = jax.nn.silu(x1) * x2
    ref = jnp.dot(h.astype(jnp.bfloat16), w3b, preferred_element_type=jnp.float32)
    ref = ref.reshape(batch, seq, dim).astype(x.dtype)
    assert jnp.allclose(out, ref, atol=1e-4, rtol=1e-3), "mismatch vs bf16 reference"

    # Sanity check against the full-f32 reference (loose tol due to bf16 operands).
    ref_f32 = (jax.nn.silu(x @ w1) * (x @ w2)) @ w3
    assert jnp.allclose(out, ref_f32, atol=5e-3, rtol=5e-2), "mismatch vs f32 reference"

    print("KERNEL_OK")
</pallas_src>

<mosaic_0001>
module attributes {stable_mosaic.version = 11 : i64} {
  func.func @_ffn_kernel(%arg0: i32, %arg1: i32, %arg2: memref<16x32xbf16, #tpu.memory_space<vmem>>, %arg3: memref<32x256xbf16, #tpu.memory_space<vmem>>, %arg4: memref<128x32xbf16, #tpu.memory_space<vmem>>, %arg5: memref<16x32xf32, #tpu.memory_space<vmem>>, %arg6: memref<16x32xf32, #tpu.memory_space<vmem>>) attributes {dimension_semantics = [#tpu.dimension_semantics<parallel>, #tpu.dimension_semantics<arbitrary>], iteration_bounds = array<i64: 1, 1>, scalar_prefetch = 0 : i64, scratch_operands = 1 : i64, tpu.core_type = #tpu.core_type<tc>, window_params = [{transform_indices = @transform_0, window_bounds = array<i64: 16, 32>}, {transform_indices = @transform_1, window_bounds = array<i64: 32, 256>}, {transform_indices = @transform_2, window_bounds = array<i64: 128, 32>}, {transform_indices = @transform_3, window_bounds = array<i64: 16, 32>}]} {
    %c0_i32 = arith.constant 0 : i32
    %0 = arith.cmpi eq, %arg1, %c0_i32 : i32
    %1 = arith.extui %0 : i1 to i32
    %c0_i32_0 = arith.constant 0 : i32
    %2 = arith.cmpi ne, %1, %c0_i32_0 : i32
    scf.if %2 {
      %cst_14 = arith.constant 0.000000e+00 : f32
      %24 = vector.broadcast %cst_14 : f32 to vector<16x32xf32>
      %c0_15 = arith.constant 0 : index
      %c0_16 = arith.constant 0 : index
      %25 = vector.load %arg6[%c0_15, %c0_16] : memref<16x32xf32, #tpu.memory_space<vmem>>, vector<16x32xf32>
      tpu.vector_store %arg6[%c0_15, %c0_16], %24 {strides = array<i32>} : memref<16x32xf32, #tpu.memory_space<vmem>>, vector<16x32xf32>,
    } else {
    }
    %c0 = arith.constant 0 : index
    %c0_1 = arith.constant 0 : index
    %3 = vector.load %arg2[%c0, %c0_1] : memref<16x32xbf16, #tpu.memory_space<vmem>>, vector<16x32xbf16>
    %c0_2 = arith.constant 0 : index
    %c0_3 = arith.constant 0 : index
    %4 = vector.load %arg3[%c0_2, %c0_3] : memref<32x256xbf16, #tpu.memory_space<vmem>>, vector<32x256xbf16>
    %cst = arith.constant dense<0.000000e+00> : vector<16x256xf32>
    %5 = tpu.matmul %3, %4, %cst {dimension_numbers = #tpu.dot_dimension_numbers<[1], [0], [0], [1], [0, 0, 1, 1], [], []>} : vector<16x32xbf16>, vector<32x256xbf16>, vector<16x256xf32> -> vector<16x256xf32>
    %6 = vector.extract_strided_slice %5 {offsets = [0, 0], sizes = [16, 128], strides = [1, 1]} : vector<16x256xf32> to vector<16x128xf32>
    %7 = vector.extract_strided_slice %5 {offsets = [0, 128], sizes = [16, 128], strides = [1, 1]} : vector<16x256xf32> to vector<16x128xf32>
    %8 = arith.negf %6 : vector<16x128xf32>
    %9 = math.exp %8 : vector<16x128xf32>
    %cst_4 = arith.constant 1.000000e+00 : f32
    %10 = vector.broadcast %cst_4 : f32 to vector<16x128xf32>
    %11 = arith.addf %10, %9 : vector<16x128xf32>
    %12 = arith.divf %10, %11 : vector<16x128xf32>
    %13 = arith.mulf %6, %12 : vector<16x128xf32>
    %14 = arith.mulf %13, %7 : vector<16x128xf32>
    %c0_5 = arith.constant 0 : index
    %c0_6 = arith.constant 0 : index
    %15 = vector.load %arg6[%c0_5, %c0_6] : memref<16x32xf32, #tpu.memory_space<vmem>>, vector<16x32xf32>
    %16 = arith.truncf %14 : vector<16x128xf32> to vector<16x128xbf16>
    %c0_7 = arith.constant 0 : index
    %c0_8 = arith.constant 0 : index
    %17 = vector.load %arg4[%c0_7, %c0_8] : memref<128x32xbf16, #tpu.memory_space<vmem>>, vector<128x32xbf16>
    %cst_9 = arith.constant dense<0.000000e+00> : vector<16x32xf32>
    %18 = tpu.matmul %16, %17, %cst_9 {dimension_numbers = #tpu.dot_dimension_numbers<[1], [0], [0], [1], [0, 0, 1, 1], [], []>} : vector<16x128xbf16>, vector<128x32xbf16>, vector<16x32xf32> -> vector<16x32xf32>
    %19 = arith.addf %15, %18 : vector<16x32xf32>
    %c0_10 = arith.constant 0 : index
    %c0_11 = arith.constant 0 : index
    %20 = vector.load %arg6[%c0_10, %c0_11] : memref<16x32xf32, #tpu.memory_space<vmem>>, vector<16x32xf32>
    tpu.vector_store %arg6[%c0_10, %c0_11], %19 {strides = array<i32>} : memref<16x32xf32, #tpu.memory_space<vmem>>, vector<16x32xf32>,
    %c0_i32_12 = arith.constant 0 : i32
    %21 = arith.cmpi eq, %arg1, %c0_i32_12 : i32
    %22 = arith.extui %21 : i1 to i32
    %c0_i32_13 = arith.constant 0 : i32
    %23 = arith.cmpi ne, %22, %c0_i32_13 : i32
    scf.if %23 {
      %c0_14 = arith.constant 0 : index
      %c0_15 = arith.constant 0 : index
      %24 = vector.load %arg6[%c0_14, %c0_15] : memref<16x32xf32, #tpu.memory_space<vmem>>, vector<16x32xf32>
      %c0_16 = arith.constant 0 : index
      %c0_17 = arith.constant 0 : index
      %25 = vector.load %arg5[%c0_16, %c0_17] : memref<16x32xf32, #tpu.memory_space<vmem>>, vector<16x32xf32>
      tpu.vector_store %arg5[%c0_16, %c0_17], %24 {strides = array<i32>} : memref<16x32xf32, #tpu.memory_space<vmem>>, vector<16x32xf32>,
    } else {
    }
    return
  }
  func.func @transform_0(%arg0: i32, %arg1: i32) -> (i32, i32) {
    %c0_i32 = arith.constant 0 : i32
    %c0_i32_0 = arith.constant 0 : i32
    return %arg0, %c0_i32 : i32, i32
  }
  func.func @transform_1(%arg0: i32, %arg1: i32) -> (i32, i32) {
    %c0_i32 = arith.constant 0 : i32
    %c0_i32_0 = arith.constant 0 : i32
    return %c0_i32, %arg1 : i32, i32
  }
  func.func @transform_2(%arg0: i32, %arg1: i32) -> (i32, i32) {
    %c0_i32 = arith.constant 0 : i32
    %c0_i32_0 = arith.constant 0 : i32
    return %arg1, %c0_i32 : i32, i32
  }
  func.func @transform_3(%arg0: i32, %arg1: i32) -> (i32, i32) {
    %c0_i32 = arith.constant 0 : i32
    %c0_i32_0 = arith.constant 0 : i32
    return %arg0, %c0_i32 : i32, i32
  }
}

</mosaic_0001>

<bundles_post_ra>
// kernel: feed_forward_packed.1
= control target key start
LH: loop header
LB: loop body
LE: loop exit
PB: predicated region body
PF: predicated region fallthrough
CT: control target
= control target key end

     0   :  { %v350_v2 = vmov 0   ;;  %vm20_vm0 = vcmask 261120   ;;  %s434_s0 = inlined_call_operand.vmem [shape: bf16[16,32], index: 0, kind: input, shape index: {}]   ;;  %s435_s1 = inlined_call_operand.vmem [shape: bf16[32,256], index: 1, kind: input, shape index: {}]   ;;  %s436_s2 = inlined_call_operand.vmem [shape: bf16[128,32], index: 2, kind: input, shape index: {}]   ;;  %s437_s3 = inlined_call_operand.hbm [shape: f32[16,32], index: 3, kind: output, shape index: {}]  }
   0x1   :  { %v303_v0 = vld [vmem:[%s435_s1 + $0x4] ss:$8 sps:$4 sm:$0xff]   ;;  %v305_v1 = vld [vmem:[%s435_s1] ss:$8 sps:$4 sm:$0xff]   ;;  %90 = vmatprep.mubr.bf16.mxu0 %v350_v2  ;;  %v306_v3 = vld [vmem:[%s435_s1 + $0x14] ss:$8 sps:$4 sm:$0xff]  }
   0x2   :  { %58 = vmatprep.subr.bf16.mxu0 %v303_v0  ;;  %v308_v4 = vld [vmem:[%s435_s1 + $0x10] ss:$8 sps:$4 sm:$0xff]   ;;  %v309_v5 = vld [vmem:[%s434_s0] sm:$0xff]  }
   0x3   :  { %59 = vmatpush1.bf16.msra.mxu0 %v305_v1 }
   0x4   :  { %60 = vmatprep.subr.bf16.mxu0 %v306_v3 }
   0x7   :  { %61 = vmatpush1.bf16.msra.mxu0 %v308_v4 }
   0x8   :  { %8 = vsyncpa [#allocation4], 0  ;;  %v310_v6 = vld [vmem:[%s436_s2] sm:$0xff]   ;;  %v351_v7 = vmov 0.0   ;;  %v311_v8 = vld [vmem:[%s436_s2 + $0x8] sm:$0xff]   ;;  %vm352_vm1 = vmmov 0  }
   0x9   :  { %277 = vmatprep.subr.bf16.mxu1 %v351_v7  ;;  %21 = vst.msk [vmem:[#allocation2] sm:$0xff] %vm20_vm0, %v351_v7  ;;  %22 = vst.msk [vmem:[#allocation2 + $0x8] sm:$0xff] %vm20_vm0, %v351_v7  ;;  %v312_v9 = vld [vmem:[%s436_s2 + $0x10] sm:$0xff]   ;;  %v313_v10 = vld [vmem:[%s436_s2 + $0x18] sm:$0xff]   ;;  %293 = vmatprep.mubr.msk.bf16.mxu1 %vm352_vm1, %v351_v7 }
   0xa   :  { %257 = vmatmul.mubr.msk.bf16.vlgmr.msra.gmra.mrb[0].mxu0 %vm20_vm0, %v309_v5  ;;  %278 = vmatpush3.bf16.msra.mxu1 %v310_v6  ;;  %v314_v11 = vld [vmem:[%s436_s2 + $0x20] sm:$0xff]   ;;  %v315_v12 = vld [vmem:[%s436_s2 + $0x28] sm:$0xff]   ;;  %v316_v13 = vld [vmem:[%s436_s2 + $0x30] sm:$0xff]  }
   0xb   :  { %279 = vmatprep.subr.bf16.mxu1 %v351_v7  ;;  %v317_v14 = vld [vmem:[%s436_s2 + $0x38] sm:$0xff]   ;;  %s353_s2 = smov [#allocation3]  }
   0xc   :  { %s241_s9 = sshll.u32 %s353_s2, 4  ;;  %s242_s9 = int_to_ptr.vmem [resolvable:$true] %s241_s9 }
   0xd   :  { %s326_s10 = scalar_lea.vmem %s242_s9, 256  ;;  %p331_p1 = scmp.lt.s32.totalorder %s242_s9, %s242_s9 }
   0xe   :  { %280 = vmatpush3.bf16.msra.mxu1 %v311_v8  ;;  %p327_p0 = scmp.ne.s32.totalorder %s242_s9, %s326_s10  ;;  %p332_p2 = scmp.lt.s32.totalorder %s326_s10, %s326_s10 }
   0xf   :  { %281 = vmatprep.subr.bf16.mxu1 %v351_v7 }
  0x10   :  { %v117_v32 = vld [vmem:[#allocation2] sm:$0xff]  ;;  %v118_v34 = vld [vmem:[#allocation2 + $0x8] sm:$0xff]  ;;  %p333_p3 = por %p332_p2, %p331_p1 }
  0x12   :  { %282 = vmatpush3.bf16.msra.mxu1 %v312_v9  ;;  %p334_p4 = pnand %p333_p3, %p327_p0 }
  0x13   :  { %283 = vmatprep.subr.bf16.mxu1 %v351_v7 }
  0x16   :  { %284 = vmatpush3.bf16.msra.mxu1 %v313_v10 }
  0x17   :  { %285 = vmatprep.subr.bf16.mxu1 %v351_v7 }
  0x1a   :  { %286 = vmatpush3.bf16.msra.mxu1 %v314_v11 }
  0x1b   :  { %287 = vmatprep.subr.bf16.mxu1 %v351_v7 }
  0x1e   :  { %288 = vmatpush3.bf16.msra.mxu1 %v315_v12 }
  0x1f   :  { %289 = vmatprep.subr.bf16.mxu1 %v351_v7 }
  0x22   :  { %290 = vmatpush3.bf16.msra.mxu1 %v316_v13 }
  0x23   :  { %291 = vmatprep.subr.bf16.mxu1 %v351_v7 }
  0x26   :  { %292 = vmatpush3.bf16.msra.mxu1 %v317_v14 }
  0xdd   :  { %v92_v15 = vpop.f32.mrb[0].mxu0 }
  0xde   :  { %v258_v16 = vmul.f32 -1.442695, %v92_v15  ;;  %v94_v17 = vpop.f32.mrb[1].mxu0 }
  0xdf   :  { %v96_v18 = vpop.f32.mrb[2].mxu0 }
  0xe0   :  { %318 = vpow2.f32 %v258_v16  ;;  %v259_v19 = vmul.f32 -1.442695, %v96_v18  ;;  %v98_v20 = vpop.f32.mrb[3].mxu0 }
  0xe2   :  { %320 = vpow2.f32 %v259_v19 }
  0xea   :  { %v319_v21 = vpop.eup %318 }
  0xeb   :  { %v107_v22 = vadd.f32 1.0, %v319_v21 }
  0xec   :  { %v321_v23 = vpop.eup %320 }
  0xed   :  { %322 = vrcp.f32 %v107_v22  ;;  %v108_v24 = vadd.f32 1.0, %v321_v23 }
  0xef   :  { %324 = vrcp.f32 %v108_v24 }
  0xf7   :  { %v323_v25 = vpop.eup %322 }
  0xf8   :  { %v113_v26 = vmul.f32 %v323_v25, %v92_v15 }
  0xf9   :  { %v325_v27 = vpop.eup %324 }
  0xfa   :  { %v115_v28 = vmul.f32 %v113_v26, %v94_v17  ;;  %v114_v29 = vmul.f32 %v325_v27, %v96_v18 }
  0xfc   :  { %v116_v30 = vmul.f32 %v114_v29, %v98_v20 }
  0xfe   :  { %v119_v31 = vpack.c.bf16 %v116_v30, %v115_v28 }
 0x100   :  { %294 = vmatmul.mubr.bf16.vlgmr.msra.gmra.mrb[0].mxu1 %v119_v31 }
 0x1d3   :  { %v218_v33 = vpop.f32.mrb[0].mxu1 }
 0x1d4   :  { %v225_v35 = vadd.f32 %v218_v33, %v117_v32  ;;  %v295_v36 = vpop.f32.mrb[1].mxu1 }
 0x1d5   :  { %v221_v37 = vpop.f32.mrb[2].mxu1 }
 0x1d6   :  { %227 = vst.msk [vmem:[#allocation2] sm:$0xff] %vm20_vm0, %v225_v35  ;;  %v226_v38 = vadd.f32 %v221_v37, %v118_v34  ;;  %v296_v39 = vpop.f32.mrb[3].mxu1 }
 0x1d8   :  { %228 = vst.msk [vmem:[#allocation2 + $0x8] sm:$0xff] %vm20_vm0, %v226_v38 }
 0x1dd   :  { %v232_v40 = vld [vmem:[#allocation2] sm:$0xff] }
 0x1de   :  { %234 = vst.msk [vmem:[#allocation3] sm:$0xff] %vm20_vm0, %v232_v40 }
 0x1df   :  { %v233_v41 = vld [vmem:[#allocation2 + $0x8] sm:$0xff] }
 0x1e0   :  { %235 = vst.msk [vmem:[#allocation3 + $0x8] sm:$0xff] %vm20_vm0, %v233_v41 }
 0x1e1   :  { %337 = shalt.err (!%p334_p4)
}
 0x1e2   :  { %s338_s13 = scalar_lea.hbm %s437_s3, 256 }
 0x1e3   :  { %p339_p5 = scmp.ne.s32.totalorder %s437_s3, %s338_s13  ;;  %p342_p6 = scmp.lt.u32.totalorder %s338_s13, %s437_s3 }
 0x1e5   :  { %p344_p7 = pnand %p342_p6, %p339_p5 }
 0x1e7   :  { %347 = shalt.err (!%p344_p7)
}
 0x1e8   :  { %s354_s18 = smov 128   ;;  %s355_s19 = smov 8  }
 0x1e9   :  { %247 = dma.vmem_to_hbm [thread:$0]  %s242_s9, 256, %s437_s3, [#allocation4], %s354_s18, %s354_s18, %s355_s19  }
 0x1ea   :  { %348 = dma.done.wait [#allocation4], 256  }
 0x1eb   :  { %349 = vsyncadd [#allocation4], 4294967040 }
 0x1ec   :  { %251 = vsyncpa [#allocation4], 1 }

</bundles_post_ra>
